<compile_context>
chip_gen: v6e
topology: v6e:2x2x1
jax: 0.10.0
libtpu: 0.0.40
codegen_flags: <defaults>
</compile_context>

<pallas_src>
import math

import jax
import jax.numpy as jnp
from jax.experimental import pallas as pl
from jax.experimental.pallas import tpu as pltpu

_INV_SQRT2 = 1.0 / math.sqrt(2.0)
_SQRT_2_OVER_PI = math.sqrt(2.0 / math.pi)


def _round_up(v, m):
    return (v + m - 1) // m * m


# ----------------------------------------------------------------------------- kernels
def _make_ffn_kernel(acc_in_output: bool, approximate_gelu: bool):
    def _gelu(h):
        if approximate_gelu:
            # tanh approximation -> transcendental goes to the EUP slot.
            return 0.5 * h * (1.0 + jnp.tanh(_SQRT_2_OVER_PI * (h + 0.044715 * h * h * h)))
        # Exact GELU (matches torch.nn.GELU() default: erf-based).
        return 0.5 * h * (1.0 + jax.lax.erf(h * _INV_SQRT2))

    def _partial(x_ref, w1_ref, b1_ref, w2_ref):
        # Cast x to the weight dtype so bf16 weights give a pure-bf16 MXU pass on
        # matmul1 (fast mode); accumulation stays fp32 via preferred_element_type.
        h = jnp.dot(
            x_ref[...].astype(w1_ref.dtype), w1_ref[...],
            preferred_element_type=jnp.float32,
        )
        h = h + b1_ref[...]  # (1, TH) row broadcast by jnp
        g = _gelu(h)
        # matmul2: operands in the weight dtype, fp32 accumulation.
        return jnp.dot(
            g.astype(w2_ref.dtype), w2_ref[...], preferred_element_type=jnp.float32
        )

    if acc_in_output:
        # Output dtype is f32: accumulate directly in the resident output block
        # (saves a tm*tn*4 byte VMEM scratch -> headroom on v7x).
        def kernel(x_ref, w1_ref, b1_ref, w2_ref, b2_ref, o_ref):
            k = pl.program_id(2)

            @pl.when(k == 0)
            def _init():
                o_ref[...] = jnp.zeros_like(o_ref)

            o_ref[...] += _partial(x_ref, w1_ref, b1_ref, w2_ref)

            @pl.when(k == pl.num_programs(2) - 1)
            def _finalize():
                o_ref[...] = o_ref[...] + b2_ref[...]

        return kernel, False

    def kernel(x_ref, w1_ref, b1_ref, w2_ref, b2_ref, o_ref, acc_ref):
        k = pl.program_id(2)

        @pl.when(k == 0)
        def _init():
            acc_ref[...] = jnp.zeros_like(acc_ref)

        acc_ref[...] += _partial(x_ref, w1_ref, b1_ref, w2_ref)

        @pl.when(k == pl.num_programs(2) - 1)
        def _finalize():
            o_ref[...] = (acc_ref[...] + b2_ref[...]).astype(o_ref.dtype)

    return kernel, True


# ------------------------------------------------------------------- tile / VMEM sizing
def _vmem_budget_bytes():
    """~80% of the physical VMEM of the current chip (51 MiB v7x, 102 MiB v5e/v6e)."""
    try:
        cap = int(pltpu.get_tpu_info().vmem_capacity_bytes)
        if cap <= 0:
            raise ValueError
    except Exception:
        cap = 64 << 20  # conservative fallback: works on every generation
    return int(cap * 0.8)


def _select_tiles(m, in_dim, hid, out_dim, x_isz, w1_isz, w2_isz, out_isz,
                  acc_in_output, vmem_budget, tm, th, tn):
    in_p = _round_up(in_dim, 128)
    tm_fixed, th_fixed, tn_fixed = tm is not None, th is not None, tn is not None
    tm = _round_up(tm, 8) if tm_fixed else min(512, _round_up(m, 8))
    th = _round_up(th, 128) if th_fixed else min(1024, _round_up(hid, 128))
    tn = _round_up(tn, 128) if tn_fixed else min(4096, _round_up(out_dim, 128))

    def usage(tm_, th_, tn_):
        # Pallas double-buffers every blocked input/output; biases pad sublanes to 8.
        b = 2 * tm_ * in_p * x_isz          # x tile
        b += 2 * in_p * th_ * w1_isz        # W1 tile
        b += 2 * 8 * th_ * 4                # b1 tile (f32)
        b += 2 * th_ * tn_ * w2_isz         # W2 tile
        b += 2 * 8 * tn_ * 4                # b2 tile (f32)
        b += 2 * tm_ * tn_ * out_isz        # output tile
        if not acc_in_output:
            b += tm_ * tn_ * 4              # fp32 accumulator scratch
        return b

    margin = 2 << 20  # headroom for Mosaic internal scratch
    while usage(tm, th, tn) + margin > vmem_budget:
        if not th_fixed and th > 256:
            th = max(128, _round_up(th // 2, 128))
        elif not tn_fixed and tn > 512:
            tn = max(128, _round_up(tn // 2, 128))
        elif not tm_fixed and tm > 64:
            tm = max(8, _round_up(tm // 2, 8))
        elif not th_fixed and th > 128:
            th = max(128, _round_up(th // 2, 128))
        elif not tn_fixed and tn > 128:
            tn = max(128, _round_up(tn // 2, 128))
        elif not tm_fixed and tm > 8:
            tm = max(8, _round_up(tm // 2, 8))
        else:
            break
    return tm, th, tn, in_p


def _pad2d(a, rows, cols):
    if rows == 0 and cols == 0:
        return a  # already tile-aligned: no per-call padding traffic
    return jnp.pad(a, ((0, rows), (0, cols)))


# ------------------------------------------------------------------------------ wrapper
def feed_forward_network(x, w1, b1, w2, b2, *, tm=None, th=None, tn=None,
                         compute_dtype=None, gelu_approximate=False):
    """y = gelu(x @ w1 + b1) @ w2 + b2 with exact (erf) GELU.

    x: (..., input_dim); w1: (input_dim, hidden); b1: (hidden,)
    w2: (hidden, output_dim); b2: (output_dim,)
    compute_dtype: optional dtype (e.g. jnp.bfloat16) the weights are cast to once;
        both matmuls then run as pure passes in that dtype with fp32 accumulation.
    """
    in_dim = x.shape[-1]
    hid = w1.shape[1]
    out_dim = w2.shape[1]
    lead = x.shape[:-1]
    m = int(math.prod(lead)) if lead else 1

    if compute_dtype is not None:
        w1 = w1.astype(compute_dtype)
        w2 = w2.astype(compute_dtype)
    # Biases are added to fp32 accumulations; keep them fp32 (exact upcast).
    b1 = b1.astype(jnp.float32)
    b2 = b2.astype(jnp.float32)

    out_dtype = x.dtype
    acc_in_output = out_dtype == jnp.float32

    vmem_budget = _vmem_budget_bytes()
    tm, th, tn, in_p = _select_tiles(
        m, in_dim, hid, out_dim,
        jnp.dtype(x.dtype).itemsize, jnp.dtype(w1.dtype).itemsize,
        jnp.dtype(w2.dtype).itemsize, jnp.dtype(out_dtype).itemsize,
        acc_in_output, vmem_budget, tm, th, tn,
    )

    # Pad to tile-divisible shapes (zero padding is exact: padded hidden units see
    # h = 0 -> gelu(0) = 0 -> zero contribution).  Padding is a Python-level no-op
    # whenever the shapes are already aligned, so aligned weights are never re-read.
    m_p = _round_up(m, tm)
    h_p = _round_up(hid, th)
    out_p = _round_up(out_dim, tn)

    x2d = _pad2d(x.reshape(m, in_dim), m_p - m, in_p - in_dim)
    w1_p = _pad2d(w1, in_p - in_dim, h_p - hid)
    b1_p = _pad2d(b1.reshape(1, hid), 0, h_p - hid)
    w2_p = _pad2d(w2, h_p - hid, out_p - out_dim)
    b2_p = _pad2d(b2.reshape(1, out_dim), 0, out_p - out_dim)

    grid = (m_p // tm, out_p // tn, h_p // th)

    kernel, needs_scratch = _make_ffn_kernel(acc_in_output, gelu_approximate)
    scratch_shapes = [pltpu.VMEM((tm, tn), jnp.float32)] if needs_scratch else []

    out = pl.pallas_call(
        kernel,
        out_shape=jax.ShapeDtypeStruct((m_p, out_p), out_dtype),
        grid_spec=pltpu.PrefetchScalarGridSpec(
            num_scalar_prefetch=0,
            grid=grid,
            in_specs=[
                pl.BlockSpec((tm, in_p), lambda i, j, k: (i, 0)),    # x rows
                pl.BlockSpec((in_p, th), lambda i, j, k: (0, k)),    # W1 hidden slice
                pl.BlockSpec((1, th), lambda i, j, k: (0, k)),       # b1 hidden slice
                pl.BlockSpec((th, tn), lambda i, j, k: (k, j)),      # W2 hidden/out slice
                pl.BlockSpec((1, tn), lambda i, j, k: (0, j)),       # b2 out slice
            ],
            out_specs=pl.BlockSpec((tm, tn), lambda i, j, k: (i, j)),
            scratch_shapes=scratch_shapes,
        ),
        compiler_params=pltpu.CompilerParams(
            dimension_semantics=("parallel", "parallel", "arbitrary"),
            vmem_limit_bytes=int(vmem_budget),
        ),
    )(x2d, w1_p, b1_p, w2_p, b2_p)

    return out[:m, :out_dim].reshape(*lead, out_dim)


# --------------------------------------------------------------------------------- main
if __name__ == "__main__":
    # Small shapes consistent with the module: token features (batch, seq, input_dim)
    batch, seq = 2, 8
    input_dim, hidden_dim, output_dim = 32, 64, 32

    key = jax.random.PRNGKey(0)
    kx, k1, k2, k3, k4 = jax.random.split(key, 5)

    x = jax.random.normal(kx, (batch, seq, input_dim), dtype=jnp.float32)

    # Deterministic xavier-uniform-like init for weights, small uniform bias.
    lim1 = math.sqrt(6.0 / (input_dim + hidden_dim))
    w1 = jax.random.uniform(k1, (input_dim, hidden_dim), jnp.float32, -lim1, lim1)
    b1 = jax.random.uniform(k2, (hidden_dim,), jnp.float32, -0.01, 0.01)
    lim2 = math.sqrt(6.0 / (hidden_dim + output_dim))
    w2 = jax.random.uniform(k3, (hidden_dim, output_dim), jnp.float32, -lim2, lim2)
    b2 = jax.random.uniform(k4, (output_dim,), jnp.float32, -0.01, 0.01)

    # Reference in plain JAX (exact erf GELU, fp32, highest matmul precision).
    h_ref = jnp.dot(x, w1, precision=jax.lax.Precision.HIGHEST) + b1
    g_ref = 0.5 * h_ref * (1.0 + jax.lax.erf(h_ref * _INV_SQRT2))
    ref = jnp.dot(g_ref, w2, precision=jax.lax.Precision.HIGHEST) + b2

    # 1) fp32 path (accumulates directly in the output block).
    out = jax.block_until_ready(feed_forward_network(x, w1, b1, w2, b2))
    assert out.shape == (batch, seq, output_dim)
    assert out.dtype == x.dtype
    assert jnp.allclose(out, ref, atol=2e-5, rtol=2e-5), float(
        jnp.max(jnp.abs(out - ref))
    )

    # 2) bf16 weight fast path (pure-bf16 MXU operands, fp32 accumulation, f32 out).
    out_bf16w = jax.block_until_ready(
        feed_forward_network(x, w1, b1, w2, b2, compute_dtype=jnp.bfloat16)
    )
    assert jnp.allclose(out_bf16w, ref, atol=5e-2), float(
        jnp.max(jnp.abs(out_bf16w - ref))
    )

    # 3) bf16 activations + weights (bf16 output -> fp32 scratch accumulator path).
    out_bf16 = jax.block_until_ready(
        feed_forward_network(
            x.astype(jnp.bfloat16), w1, b1, w2, b2, compute_dtype=jnp.bfloat16
        )
    )
    assert out_bf16.dtype == jnp.bfloat16
    assert jnp.allclose(out_bf16.astype(jnp.float32), ref, atol=1e-1), float(
        jnp.max(jnp.abs(out_bf16.astype(jnp.float32) - ref))
    )

    print("KERNEL_OK")
</pallas_src>

<mosaic_0001>
module attributes {stable_mosaic.version = 11 : i64} {
  func.func @kernel(%arg0: i32, %arg1: i32, %arg2: i32, %arg3: memref<16x128xf32, #tpu.memory_space<vmem>>, %arg4: memref<128x128xf32, #tpu.memory_space<vmem>>, %arg5: memref<1x128xf32, #tpu.memory_space<vmem>>, %arg6: memref<128x128xf32, #tpu.memory_space<vmem>>, %arg7: memref<1x128xf32, #tpu.memory_space<vmem>>, %arg8: memref<16x128xf32, #tpu.memory_space<vmem>>) attributes {dimension_semantics = [#tpu.dimension_semantics<parallel>, #tpu.dimension_semantics<parallel>, #tpu.dimension_semantics<arbitrary>], iteration_bounds = array<i64: 1, 1, 1>, scalar_prefetch = 0 : i64, scratch_operands = 0 : i64, tpu.core_type = #tpu.core_type<tc>, window_params = [{transform_indices = @transform_0, window_bounds = array<i64: 16, 128>}, {transform_indices = @transform_1, window_bounds = array<i64: 128, 128>}, {transform_indices = @transform_2, window_bounds = array<i64: 1, 128>}, {transform_indices = @transform_3, window_bounds = array<i64: 128, 128>}, {transform_indices = @transform_4, window_bounds = array<i64: 1, 128>}, {transform_indices = @transform_5, window_bounds = array<i64: 16, 128>}]} {
    %c0_i32 = arith.constant 0 : i32
    %0 = arith.cmpi eq, %arg2, %c0_i32 : i32
    %1 = arith.extui %0 : i1 to i32
    %c0_i32_0 = arith.constant 0 : i32
    %2 = arith.cmpi ne, %1, %c0_i32_0 : i32
    scf.if %2 {
      %cst_18 = arith.constant 0.000000e+00 : f32
      %25 = vector.broadcast %cst_18 : f32 to vector<16x128xf32>
      %c0_19 = arith.constant 0 : index
      %c0_20 = arith.constant 0 : index
      %26 = vector.load %arg8[%c0_19, %c0_20] : memref<16x128xf32, #tpu.memory_space<vmem>>, vector<16x128xf32>
      tpu.vector_store %arg8[%c0_19, %c0_20], %25 {strides = array<i32>} : memref<16x128xf32, #tpu.memory_space<vmem>>, vector<16x128xf32>,
    } else {
    }
    %c0 = arith.constant 0 : index
    %c0_1 = arith.constant 0 : index
    %3 = vector.load %arg8[%c0, %c0_1] : memref<16x128xf32, #tpu.memory_space<vmem>>, vector<16x128xf32>
    %c0_2 = arith.constant 0 : index
    %c0_3 = arith.constant 0 : index
    %4 = vector.load %arg3[%c0_2, %c0_3] : memref<16x128xf32, #tpu.memory_space<vmem>>, vector<16x128xf32>
    %c0_4 = arith.constant 0 : index
    %c0_5 = arith.constant 0 : index
    %5 = vector.load %arg4[%c0_4, %c0_5] : memref<128x128xf32, #tpu.memory_space<vmem>>, vector<128x128xf32>
    %cst = arith.constant dense<0.000000e+00> : vector<16x128xf32>
    %6 = tpu.matmul %4, %5, %cst {dimension_numbers = #tpu.dot_dimension_numbers<[1], [0], [0], [1], [0, 0, 1, 1], [], []>} : vector<16x128xf32>, vector<128x128xf32>, vector<16x128xf32> -> vector<16x128xf32>
    %c0_6 = arith.constant 0 : index
    %c0_7 = arith.constant 0 : index
    %7 = vector.load %arg5[%c0_6, %c0_7] : memref<1x128xf32, #tpu.memory_space<vmem>>, vector<1x128xf32>
    %8 = vector.broadcast %7 : vector<1x128xf32> to vector<16x128xf32>
    %9 = arith.addf %6, %8 : vector<16x128xf32>
    %cst_8 = arith.constant 5.000000e-01 : f32
    %10 = vector.broadcast %cst_8 : f32 to vector<16x128xf32>
    %11 = arith.mulf %10, %9 : vector<16x128xf32>
    %cst_9 = arith.constant 0.707106769 : f32
    %12 = vector.broadcast %cst_9 : f32 to vector<16x128xf32>
    %13 = arith.mulf %9, %12 : vector<16x128xf32>
    %14 = math.erf %13 : vector<16x128xf32>
    %cst_10 = arith.constant 1.000000e+00 : f32
    %15 = vector.broadcast %cst_10 : f32 to vector<16x128xf32>
    %16 = arith.addf %15, %14 : vector<16x128xf32>
    %17 = arith.mulf %11, %16 : vector<16x128xf32>
    %c0_11 = arith.constant 0 : index
    %c0_12 = arith.constant 0 : index
    %18 = vector.load %arg6[%c0_11, %c0_12] : memref<128x128xf32, #tpu.memory_space<vmem>>, vector<128x128xf32>
    %cst_13 = arith.constant dense<0.000000e+00> : vector<16x128xf32>
    %19 = tpu.matmul %17, %18, %cst_13 {dimension_numbers = #tpu.dot_dimension_numbers<[1], [0], [0], [1], [0, 0, 1, 1], [], []>} : vector<16x128xf32>, vector<128x128xf32>, vector<16x128xf32> -> vector<16x128xf32>
    %20 = arith.addf %3, %19 : vector<16x128xf32>
    %c0_14 = arith.constant 0 : index
    %c0_15 = arith.constant 0 : index
    %21 = vector.load %arg8[%c0_14, %c0_15] : memref<16x128xf32, #tpu.memory_space<vmem>>, vector<16x128xf32>
    tpu.vector_store %arg8[%c0_14, %c0_15], %20 {strides = array<i32>} : memref<16x128xf32, #tpu.memory_space<vmem>>, vector<16x128xf32>,
    %c0_i32_16 = arith.constant 0 : i32
    %22 = arith.cmpi eq, %arg2, %c0_i32_16 : i32
    %23 = arith.extui %22 : i1 to i32
    %c0_i32_17 = arith.constant 0 : i32
    %24 = arith.cmpi ne, %23, %c0_i32_17 : i32
    scf.if %24 {
      %c0_18 = arith.constant 0 : index
      %c0_19 = arith.constant 0 : index
      %25 = vector.load %arg8[%c0_18, %c0_19] : memref<16x128xf32, #tpu.memory_space<vmem>>, vector<16x128xf32>
      %c0_20 = arith.constant 0 : index
      %c0_21 = arith.constant 0 : index
      %26 = vector.load %arg7[%c0_20, %c0_21] : memref<1x128xf32, #tpu.memory_space<vmem>>, vector<1x128xf32>
      %27 = vector.broadcast %26 : vector<1x128xf32> to vector<16x128xf32>
      %28 = arith.addf %25, %27 : vector<16x128xf32>
      %c0_22 = arith.constant 0 : index
      %c0_23 = arith.constant 0 : index
      %29 = vector.load %arg8[%c0_22, %c0_23] : memref<16x128xf32, #tpu.memory_space<vmem>>, vector<16x128xf32>
      tpu.vector_store %arg8[%c0_22, %c0_23], %28 {strides = array<i32>} : memref<16x128xf32, #tpu.memory_space<vmem>>, vector<16x128xf32>,
    } else {
    }
    return
  }
  func.func @transform_0(%arg0: i32, %arg1: i32, %arg2: i32) -> (i32, i32) {
    %c0_i32 = arith.constant 0 : i32
    %c0_i32_0 = arith.constant 0 : i32
    return %arg0, %c0_i32 : i32, i32
  }
  func.func @transform_1(%arg0: i32, %arg1: i32, %arg2: i32) -> (i32, i32) {
    %c0_i32 = arith.constant 0 : i32
    %c0_i32_0 = arith.constant 0 : i32
    return %c0_i32, %arg2 : i32, i32
  }
  func.func @transform_2(%arg0: i32, %arg1: i32, %arg2: i32) -> (i32, i32) {
    %c0_i32 = arith.constant 0 : i32
    %c0_i32_0 = arith.constant 0 : i32
    return %c0_i32, %arg2 : i32, i32
  }
  func.func @transform_3(%arg0: i32, %arg1: i32, %arg2: i32) -> (i32, i32) {
    %c0_i32 = arith.constant 0 : i32
    return %arg2, %arg1 : i32, i32
  }
  func.func @transform_4(%arg0: i32, %arg1: i32, %arg2: i32) -> (i32, i32) {
    %c0_i32 = arith.constant 0 : i32
    %c0_i32_0 = arith.constant 0 : i32
    return %c0_i32, %arg1 : i32, i32
  }
  func.func @transform_5(%arg0: i32, %arg1: i32, %arg2: i32) -> (i32, i32) {
    %c0_i32 = arith.constant 0 : i32
    return %arg0, %arg1 : i32, i32
  }
}

</mosaic_0001>

<bundles_post_ra>
// kernel: tpu_custom_call.1
= control target key start
LH: loop header
LB: loop body
LE: loop exit
PB: predicated region body
PF: predicated region fallthrough
CT: control target
= control target key end

     0   :  { %10 = vsyncpa [#allocation3], 0  ;;  %s580_s0 = inlined_call_operand.hbm [shape: f32[16,128], index: 0, kind: input, shape index: {}]   ;;  %s581_s1 = inlined_call_operand.hbm [shape: f32[128,128], index: 1, kind: input, shape index: {}]   ;;  %s582_s2 = inlined_call_operand.vmem [shape: f32[1,128], index: 2, kind: input, shape index: {}]   ;;  %s583_s3 = inlined_call_operand.hbm [shape: f32[128,128], index: 3, kind: input, shape index: {}]   ;;  %s584_s4 = inlined_call_operand.vmem [shape: f32[1,128], index: 4, kind: input, shape index: {}]   ;;  %s585_s5 = inlined_call_operand.hbm [shape: f32[16,128], index: 5, kind: output, shape index: {}]  }
   0x1   :  { %11 = vsyncpa [#allocation6], 0 }
   0x2   :  { %12 = vsyncpa [#allocation4], 0  ;;  %s514_s18 = smov [#allocation5]   ;;  %s515_s20 = smov [#allocation2]  }
   0x3   :  { %s30_s19 = sshll.u32 %s514_s18, 4  ;;  %s18_s21 = sshll.u32 %s515_s20, 4  ;;  %s31_s19 = int_to_ptr.vmem [resolvable:$true] %s30_s19  ;;  %s19_s21 = int_to_ptr.vmem [resolvable:$true] %s18_s21 }
   0x4   :  { %s436_s22 = scalar_lea.vmem %s31_s19, 2048  ;;  %p441_p1 = scmp.lt.s32.totalorder %s31_s19, %s31_s19 }
   0x5   :  { %p437_p0 = scmp.ne.s32.totalorder %s31_s19, %s436_s22  ;;  %p442_p2 = scmp.lt.s32.totalorder %s436_s22, %s436_s22 }
   0x7   :  { %p443_p3 = por %p442_p2, %p441_p1 }
   0x9   :  { %p444_p4 = pnand %p443_p3, %p437_p0 }
   0xb   :  { %447 = shalt.err (!%p444_p4)
}
   0xc   :  { %s516_s23 = smov 128   ;;  %s517_s24 = smov 8  }
   0xd   :  { %36 = dma.hbm_to_vmem [thread:$0]  %s581_s1, 2048, %s31_s19, [#allocation6], %s516_s23, %s516_s23, %s517_s24  }
   0xe   :  { %s456_s27 = scalar_lea.vmem %s19_s21, 256  ;;  %p461_p6 = scmp.lt.s32.totalorder %s19_s21, %s19_s21 }
   0xf   :  { %p457_p5 = scmp.ne.s32.totalorder %s19_s21, %s456_s27  ;;  %p462_p7 = scmp.lt.s32.totalorder %s456_s27, %s456_s27 }
  0x11   :  { %p463_p8 = por %p462_p7, %p461_p6 }
  0x13   :  { %p464_p9 = pnand %p463_p8, %p457_p5 }
  0x15   :  { %467 = shalt.err (!%p464_p9)
}
  0x16   :  { %24 = dma.hbm_to_vmem [thread:$0]  %s580_s0, 256, %s19_s21, [#allocation3], %s516_s23, %s516_s23, %s517_s24  }
  0x17   :  { %s518_s30 = smov [#allocation7]  }
  0x18   :  { %s44_s6 = sshll.u32 %s518_s30, 4  ;;  %s45_s6 = int_to_ptr.vmem [resolvable:$true] %s44_s6 }
  0x19   :  { %s476_s7 = scalar_lea.vmem %s45_s6, 2048  ;;  %p481_p11 = scmp.lt.s32.totalorder %s45_s6, %s45_s6 }
  0x1a   :  { %p477_p10 = scmp.ne.s32.totalorder %s45_s6, %s476_s7  ;;  %p482_p12 = scmp.lt.s32.totalorder %s476_s7, %s476_s7 }
  0x1c   :  { %p483_p13 = por %p482_p12, %p481_p11 }
  0x1e   :  { %p484_p0 = pnand %p483_p13, %p477_p10 }
  0x20   :  { %487 = shalt.err (!%p484_p0)
}
  0x21   :  { %50 = dma.hbm_to_vmem [thread:$0]  %s583_s3, 2048, %s45_s6, [#allocation6], %s516_s23, %s516_s23, %s517_s24  }
  0x22   :  { %508 = dma.done.wait [#allocation3], 256  }
  0x23   :  { %509 = vsyncadd [#allocation3], 4294967040 }
  0x24   :  { %510 = dma.done.wait [#allocation6], 4096  }
  0x25   :  { %511 = vsyncadd [#allocation6], 4294963200  ;;  %v87_v0 = vld [vmem:[#allocation5 + $0x78] sm:$0xff]  ;;  %v86_v1 = vld [vmem:[#allocation5 + $0x70] sm:$0xff]  ;;  %s519_s10 = smov [#allocation8]  }
  0x26   :  { %347 = vmatprep.subr.mxu0 %v87_v0  ;;  %v85_v2 = vld [vmem:[#allocation5 + $0x68] sm:$0xff]  ;;  %v84_v3 = vld [vmem:[#allocation5 + $0x60] sm:$0xff]  ;;  %v70_v4 = vld [vmem:[#allocation2] sm:$0xff]  ;;  %s296_s11 = sshll.u32 %s519_s10, 4  ;;  %s297_s11 = int_to_ptr.vmem [resolvable:$true] %s296_s11 }
  0x27   :  { %348 = vmatpush3.msra.mxu0 %v87_v0  ;;  %v83_v5 = vld [vmem:[#allocation5 + $0x58] sm:$0xff]  ;;  %379 = vmatprep.mubr.f32.mxu0 %v70_v4  ;;  %v194_v7 = vld [vmem:[#allocation7 + $0x70] sm:$0xff]  ;;  %v193_v9 = vld [vmem:[#allocation7 + $0x68] sm:$0xff]  ;;  %s488_s12 = scalar_lea.vmem %s297_s11, 256  ;;  %p493_p2 = scmp.lt.s32.totalorder %s297_s11, %s297_s11 }
  0x28   :  { %349 = vmatprep.subr.mxu0 %v86_v1  ;;  %v195_v6 = vld [vmem:[#allocation7 + $0x78] sm:$0xff]  ;;  %v82_v8 = vld [vmem:[#allocation5 + $0x50] sm:$0xff]  ;;  %v81_v10 = vld [vmem:[#allocation5 + $0x48] sm:$0xff]  ;;  %p489_p1 = scmp.ne.s32.totalorder %s297_s11, %s488_s12  ;;  %p494_p3 = scmp.lt.s32.totalorder %s488_s12, %s488_s12 }
  0x29   :  { %350 = vmatpush3.msra.mxu0 %v86_v1  ;;  %382 = vmatprep.subr.mxu1 %v195_v6  ;;  %v80_v11 = vld [vmem:[#allocation5 + $0x40] sm:$0xff]  ;;  %v79_v12 = vld [vmem:[#allocation5 + $0x38] sm:$0xff]  ;;  %v78_v13 = vld [vmem:[#allocation5 + $0x30] sm:$0xff] }
  0x2a   :  { %351 = vmatprep.subr.mxu0 %v85_v2  ;;  %383 = vmatpush3.msra.mxu1 %v195_v6  ;;  %v77_v14 = vld [vmem:[#allocation5 + $0x28] sm:$0xff]  ;;  %v76_v15 = vld [vmem:[#allocation5 + $0x20] sm:$0xff]  ;;  %v75_v16 = vld [vmem:[#allocation5 + $0x18] sm:$0xff]  ;;  %p495_p4 = por %p494_p3, %p493_p2 }
  0x2b   :  { %352 = vmatpush3.msra.mxu0 %v85_v2  ;;  %384 = vmatprep.subr.mxu1 %v194_v7  ;;  %v74_v17 = vld [vmem:[#allocation5 + $0x10] sm:$0xff]  ;;  %v73_v18 = vld [vmem:[#allocation5 + $0x8] sm:$0xff]  ;;  %v72_v19 = vld [vmem:[#allocation5] sm:$0xff] }
  0x2c   :  { %353 = vmatprep.subr.mxu0 %v84_v3  ;;  %385 = vmatpush3.msra.mxu1 %v194_v7  ;;  %v71_v20 = vld [vmem:[#allocation2 + $0x8] sm:$0xff]  ;;  %v192_v21 = vld [vmem:[#allocation7 + $0x60] sm:$0xff]  ;;  %v190_v23 = vld [vmem:[#allocation7 + $0x50] sm:$0xff]  ;;  %p496_p5 = pnand %p495_p4, %p489_p1 }
  0x2d   :  { %354 = vmatpush3.msra.mxu0 %v84_v3  ;;  %386 = vmatprep.subr.mxu1 %v193_v9  ;;  %v191_v22 = vld [vmem:[#allocation7 + $0x58] sm:$0xff]  ;;  %v189_v24 = vld [vmem:[#allocation7 + $0x48] sm:$0xff]  ;;  %v188_v25 = vld [vmem:[#allocation7 + $0x40] sm:$0xff] }
  0x2e   :  { %355 = vmatprep.subr.mxu0 %v83_v5  ;;  %387 = vmatpush3.msra.mxu1 %v193_v9  ;;  %v187_v26 = vld [vmem:[#allocation7 + $0x38] sm:$0xff]  ;;  %v186_v27 = vld [vmem:[#allocation7 + $0x30] sm:$0xff]  ;;  %v185_v28 = vld [vmem:[#allocation7 + $0x28] sm:$0xff] }
  0x2f   :  { %356 = vmatpush3.msra.mxu0 %v83_v5  ;;  %388 = vmatprep.subr.mxu1 %v192_v21  ;;  %v184_v29 = vld [vmem:[#allocation7 + $0x20] sm:$0xff]  ;;  %v183_v30 = vld [vmem:[#allocation7 + $0x18] sm:$0xff]  ;;  %v182_v31 = vld [vmem:[#allocation7 + $0x10] sm:$0xff] }
  0x30   :  { %357 = vmatprep.subr.mxu0 %v82_v8  ;;  %389 = vmatpush3.msra.mxu1 %v192_v21  ;;  %v181_v32 = vld [vmem:[#allocation7 + $0x8] sm:$0xff]  ;;  %v180_v33 = vld [vmem:[#allocation7] sm:$0xff]  ;;  %v309_v34 = vld [vmem:[%s582_s2] ss:$0 sm:$0xff] }
  0x31   :  { %358 = vmatpush3.msra.mxu0 %v82_v8  ;;  %390 = vmatprep.subr.mxu1 %v191_v22  ;;  %v310_v50 = vld [vmem:[%s584_s4] ss:$0 sm:$0xff] }
  0x32   :  { %359 = vmatprep.subr.mxu0 %v81_v10  ;;  %391 = vmatpush3.msra.mxu1 %v191_v22 }
  0x33   :  { %360 = vmatpush3.msra.mxu0 %v81_v10  ;;  %392 = vmatprep.subr.mxu1 %v190_v23 }
  0x34   :  { %361 = vmatprep.subr.mxu0 %v80_v11  ;;  %393 = vmatpush3.msra.mxu1 %v190_v23 }
  0x35   :  { %362 = vmatpush3.msra.mxu0 %v80_v11  ;;  %394 = vmatprep.subr.mxu1 %v189_v24 }
  0x36   :  { %363 = vmatprep.subr.mxu0 %v79_v12  ;;  %395 = vmatpush3.msra.mxu1 %v189_v24 }
  0x37   :  { %364 = vmatpush3.msra.mxu0 %v79_v12  ;;  %396 = vmatprep.subr.mxu1 %v188_v25 }
  0x38   :  { %365 = vmatprep.subr.mxu0 %v78_v13  ;;  %397 = vmatpush3.msra.mxu1 %v188_v25 }
  0x39   :  { %366 = vmatpush3.msra.mxu0 %v78_v13  ;;  %398 = vmatprep.subr.mxu1 %v187_v26 }
  0x3a   :  { %367 = vmatprep.subr.mxu0 %v77_v14  ;;  %399 = vmatpush3.msra.mxu1 %v187_v26 }
  0x3b   :  { %368 = vmatpush3.msra.mxu0 %v77_v14  ;;  %400 = vmatprep.subr.mxu1 %v186_v27 }
  0x3c   :  { %369 = vmatprep.subr.mxu0 %v76_v15  ;;  %401 = vmatpush3.msra.mxu1 %v186_v27 }
  0x3d   :  { %370 = vmatpush3.msra.mxu0 %v76_v15  ;;  %402 = vmatprep.subr.mxu1 %v185_v28 }
  0x3e   :  { %371 = vmatprep.subr.mxu0 %v75_v16  ;;  %403 = vmatpush3.msra.mxu1 %v185_v28 }
  0x3f   :  { %372 = vmatpush3.msra.mxu0 %v75_v16  ;;  %404 = vmatprep.subr.mxu1 %v184_v29 }
  0x40   :  { %373 = vmatprep.subr.mxu0 %v74_v17  ;;  %405 = vmatpush3.msra.mxu1 %v184_v29 }
  0x41   :  { %374 = vmatpush3.msra.mxu0 %v74_v17  ;;  %406 = vmatprep.subr.mxu1 %v183_v30 }
  0x42   :  { %375 = vmatprep.subr.mxu0 %v73_v18  ;;  %407 = vmatpush3.msra.mxu1 %v183_v30 }
  0x43   :  { %376 = vmatpush3.msra.mxu0 %v73_v18  ;;  %408 = vmatprep.subr.mxu1 %v182_v31 }
  0x44   :  { %377 = vmatprep.subr.mxu0 %v72_v19  ;;  %409 = vmatpush3.msra.mxu1 %v182_v31 }
  0x45   :  { %378 = vmatpush3.msra.mxu0 %v72_v19  ;;  %410 = vmatprep.subr.mxu1 %v181_v32 }
  0x46   :  { %380 = vmatmul.mubr.f32.vlgmr.msra.gmra.mxu0 %v71_v20  ;;  %411 = vmatpush3.msra.mxu1 %v181_v32 }
  0x47   :  { %412 = vmatprep.subr.mxu1 %v180_v33 }
  0x48   :  { %413 = vmatpush3.msra.mxu1 %v180_v33 }
 0x106   :  { %v381_v35 = vpop.f32.mrf.mxu0 }
 0x107   :  { %v167_v36 = vadd.f32 %v381_v35, %v309_v34 }
 0x108   :  { %v161_v37 = vpop.f32.mrf.mxu0 }
 0x109   :  { %v173_v38 = vmul.f32 0.70710677, %v167_v36  ;;  %v162_v39 = vadd.f32 %v309_v34, %v161_v37  ;;  %v171_v46 = vmul.f32 0.5, %v167_v36 }
 0x10b   :  { %424 = verf.f32 %v173_v38  ;;  %v172_v40 = vmul.f32 0.70710677, %v162_v39  ;;  %v170_v44 = vmul.f32 0.5, %v162_v39 }
 0x10d   :  { %426 = verf.f32 %v172_v40 }
 0x118   :  { %v425_v41 = vpop.eup %424 }
 0x119   :  { %v177_v43 = vadd.f32 1.0, %v425_v41 }
 0x11a   :  { %v427_v42 = vpop.eup %426 }
 0x11b   :  { %v176_v45 = vadd.f32 1.0, %v427_v42  ;;  %v179_v48 = vmul.f32 %v177_v43, %v171_v46 }
 0x11d   :  { %v178_v47 = vmul.f32 %v176_v45, %v170_v44 }
 0x11f   :  { %414 = vmatprep.mubr.f32.mxu1 %v178_v47 }
 0x120   :  { %415 = vmatmul.mubr.f32.vlgmr.msra.gmra.mxu1 %v179_v48 }
 0x1e0   :  { %v416_v49 = vpop.f32.mrf.mxu1 }
 0x1e1   :  { %v288_v52 = vadd.f32 %v416_v49, %v310_v50 }
 0x1e2   :  { %v262_v51 = vpop.f32.mrf.mxu1 }
 0x1e3   :  { %v287_v53 = vadd.f32 %v310_v50, %v262_v51  ;;  %290 = vst [vmem:[#allocation8 + $0x8] sm:$0xff] %v288_v52 }
 0x1e5   :  { %289 = vst [vmem:[#allocation8] sm:$0xff] %v287_v53 }
 0x1e6   :  { %499 = shalt.err (!%p496_p5)
}
 0x1e7   :  { %302 = dma.vmem_to_hbm [thread:$0]  %s297_s11, 256, %s585_s5, [#allocation4], %s516_s23, %s516_s23, %s517_s24  }
 0x1e8   :  { %512 = dma.done.wait [#allocation4], 256  }
 0x1e9   :  { %513 = vsyncadd [#allocation4], 4294967040 }
 0x1ea   :  { %306 = vsyncpa [#allocation3], 1 }
 0x1eb   :  { %307 = vsyncpa [#allocation6], 1 }
 0x1ec   :  { %308 = vsyncpa [#allocation4], 1 }

</bundles_post_ra>
